<compile_context>
chip_gen: v7x
topology: tpu7x:2x2x1
jax: 0.10.0
libtpu: 0.0.40
codegen_flags: <defaults>
</compile_context>

<pallas_src>
import functools

import jax
import jax.numpy as jnp
from jax import lax
from jax.experimental import pallas as pl
from jax.experimental.pallas import tpu as pltpu

_LANES = 128            # TPU lane width (last dim of every vreg / tile)
_SUBLANES = 8           # f32 sublane count (accumulator vreg rows)
_MAX_TILE_ROWS = 2048   # (2048,128) f32 = 1 MiB per input per buffer
_MASK = -1e30           # finite "-inf": exp(_MASK - finite) underflows to 0 in f32


def _logits(s_raw, *, m, gamma, positive):
    """Per-element circle-loss logit, computed in f32."""
    s = s_raw.astype(jnp.float32)
    if positive:
        a = jnp.maximum(-s + (1.0 + m), 0.0)        # ap = clamp_min(-sp + 1 + m, 0)
        return -a * (s - (1.0 - m)) * gamma          # logit_p
    a = jnp.maximum(s + m, 0.0)                      # an = clamp_min(sn + m, 0)
    return a * (s - m) * gamma                       # logit_n


def _softplus(z):
    # Numerically stable softplus(z) = log1p(exp(z)).
    return jnp.maximum(z, 0.0) + jnp.log1p(jnp.exp(-jnp.abs(z)))


# ---------------------------------------------------------------------------
# Fast path: both inputs fit in one VMEM tile each (typical CircleLoss usage).
# No grid, no accumulator scratch; masking is resolved statically.
# ---------------------------------------------------------------------------
def _single_tile_kernel(sp_ref, sn_ref, out_ref, *, m, gamma, np_total, nn_total):
    def lse(ref, total, positive):
        logit = _logits(ref[...], m=m, gamma=gamma, positive=positive)
        rows, lanes = ref.shape
        if rows * lanes != total:                    # static: mask only if padded
            row = lax.broadcasted_iota(jnp.int32, (rows, lanes), 0)
            lane = lax.broadcasted_iota(jnp.int32, (rows, lanes), 1)
            logit = jnp.where(row * lanes + lane < total, logit, _MASK)
        mx = jnp.max(logit)
        return mx + jnp.log(jnp.sum(jnp.exp(logit - mx)))

    z = lse(sp_ref, np_total, True) + lse(sn_ref, nn_total, False)
    out_ref[0, 0] = _softplus(z)


# ---------------------------------------------------------------------------
# Streaming path: 1-D "arbitrary" grid, online (streaming) logsumexp with
# full-vreg (8,128) running (max, sum) accumulators in VMEM scratch.
# ---------------------------------------------------------------------------
def _streaming_kernel(sp_ref, sn_ref, out_ref,
                      m_p_ref, s_p_ref, m_n_ref, s_n_ref, *,
                      m, gamma, np_total, nn_total, tile_rows):
    t = pl.program_id(0)
    tile_elems = tile_rows * _LANES

    @pl.when(t == 0)
    def _init():
        for m_ref, s_ref in ((m_p_ref, s_p_ref), (m_n_ref, s_n_ref)):
            m_ref[...] = jnp.full((_SUBLANES, _LANES), _MASK, jnp.float32)
            s_ref[...] = jnp.zeros((_SUBLANES, _LANES), jnp.float32)

    def online_update(logit, m_ref, s_ref):
        # (tile_rows,128) -> (tile_rows//8, 8, 128): pure vreg-wise reductions,
        # no cross-sublane XLU work per step.
        lt = logit.reshape(tile_rows // _SUBLANES, _SUBLANES, _LANES)
        m_old = m_ref[...]
        m_new = jnp.maximum(m_old, jnp.max(lt, axis=0))
        p_sum = jnp.sum(jnp.exp(lt - m_new[None, :, :]), axis=0)
        s_ref[...] = s_ref[...] * jnp.exp(m_old - m_new) + p_sum
        m_ref[...] = m_new

    def process(ref, total, m_ref, s_ref, positive):
        logit = _logits(ref[...], m=m, gamma=gamma, positive=positive)
        tile_end = (t + 1) * tile_elems

        @pl.when(tile_end <= total)          # interior tile: no mask work at all
        def _fast():
            online_update(logit, m_ref, s_ref)

        @pl.when(tile_end > total)           # boundary / past-the-end tile: mask
        def _masked():
            row = lax.broadcasted_iota(jnp.int32, (tile_rows, _LANES), 0)
            lane = lax.broadcasted_iota(jnp.int32, (tile_rows, _LANES), 1)
            gidx = t * tile_elems + row * _LANES + lane
            online_update(jnp.where(gidx < total, logit, _MASK), m_ref, s_ref)

    process(sp_ref, np_total, m_p_ref, s_p_ref, True)
    process(sn_ref, nn_total, m_n_ref, s_n_ref, False)

    @pl.when(t == pl.num_programs(0) - 1)
    def _finalize():
        def acc_lse(m_ref, s_ref):
            mv, sv = m_ref[...], s_ref[...]
            mx = jnp.max(mv)                                  # one-shot XLU reduce
            return mx + jnp.log(jnp.sum(sv * jnp.exp(mv - mx)))

        z = acc_lse(m_p_ref, s_p_ref) + acc_lse(m_n_ref, s_n_ref)
        out_ref[0, 0] = _softplus(z)


# ---------------------------------------------------------------------------
# Wrapper
# ---------------------------------------------------------------------------
def _to_rows(x):
    """Flat array -> (rows, 128); pads only the <128-element tail (zero copies
    when the length is already a multiple of 128)."""
    n = int(x.size)
    rows = pl.cdiv(n, _LANES)
    flat = x.reshape(-1)
    pad = rows * _LANES - n
    if pad:
        flat = jnp.pad(flat, (0, pad))       # pad value irrelevant: masked in-kernel
    return flat.reshape(rows, _LANES), rows


def circle_loss(sp: jax.Array, sn: jax.Array, m: float, gamma: float,
                *, max_tile_rows: int = _MAX_TILE_ROWS) -> jax.Array:
    """Pallas TPU implementation of CircleLoss.forward. Returns a scalar."""
    np_total, nn_total = int(sp.size), int(sn.size)
    assert np_total > 0 and nn_total > 0, "CircleLoss requires non-empty sp / sn"
    assert max(np_total, nn_total) < 2**31, "in-kernel indices are int32"

    sp2, rows_p = _to_rows(sp)
    sn2, rows_n = _to_rows(sn)
    max_rows = max(rows_p, rows_n)

    if max_rows <= max_tile_rows:
        kernel = functools.partial(
            _single_tile_kernel, m=float(m), gamma=float(gamma),
            np_total=np_total, nn_total=nn_total)
        out = pl.pallas_call(
            kernel,
            out_shape=jax.ShapeDtypeStruct((1, 1), jnp.float32),
            in_specs=[pl.BlockSpec(memory_space=pltpu.MemorySpace.VMEM)] * 2,
            out_specs=pl.BlockSpec(memory_space=pltpu.MemorySpace.SMEM),
        )(sp2, sn2)
        return out[0, 0]

    # dtype-dependent sublane packing: 8 rows (f32) / 16 (bf16) / 32 (int8, fp8)
    pack = max(8 * (4 // sp2.dtype.itemsize), 8 * (4 // sn2.dtype.itemsize), _SUBLANES)
    tile_rows = max(pack, (max_tile_rows // pack) * pack)
    num_tiles = pl.cdiv(max_rows, tile_rows)
    tiles_p = pl.cdiv(rows_p, tile_rows)
    tiles_n = pl.cdiv(rows_n, tile_rows)

    kernel = functools.partial(
        _streaming_kernel, m=float(m), gamma=float(gamma),
        np_total=np_total, nn_total=nn_total, tile_rows=tile_rows)

    out = pl.pallas_call(
        kernel,
        out_shape=jax.ShapeDtypeStruct((1, 1), jnp.float32),
        grid=(num_tiles,),
        in_specs=[
            # Clamp the block index for the shorter input; steps past its end
            # re-map to its last block (Pallas elides the repeated DMA) and are
            # fully masked in-kernel.
            pl.BlockSpec((tile_rows, _LANES),
                         lambda t, _c=tiles_p - 1: (jnp.minimum(t, _c), 0)),
            pl.BlockSpec((tile_rows, _LANES),
                         lambda t, _c=tiles_n - 1: (jnp.minimum(t, _c), 0)),
        ],
        out_specs=pl.BlockSpec(memory_space=pltpu.MemorySpace.SMEM),
        scratch_shapes=[pltpu.VMEM((_SUBLANES, _LANES), jnp.float32)] * 4,
        compiler_params=pltpu.CompilerParams(
            dimension_semantics=("arbitrary",)),          # streamed reduction axis
    )(sp2, sn2)
    return out[0, 0]


def _reference(sp, sn, m, gamma):
    sp = sp.astype(jnp.float32)
    sn = sn.astype(jnp.float32)
    ap = jnp.maximum(-sp + 1.0 + m, 0.0)
    an = jnp.maximum(sn + m, 0.0)
    logit_p = -ap * (sp - (1.0 - m)) * gamma
    logit_n = an * (sn - m) * gamma
    z = jax.scipy.special.logsumexp(logit_n) + jax.scipy.special.logsumexp(logit_p)
    return jax.nn.softplus(z)


if __name__ == "__main__":
    key = jax.random.PRNGKey(0)
    k1, k2, k3, k4, k5, k6 = jax.random.split(key, 6)

    m, gamma = 0.25, 64.0   # deterministic hyperparameters from __init__

    # Case 1: tiny f32 similarity-score vectors (module's typical usage) -> fast path.
    sp = jax.random.uniform(k1, (8,), minval=-1.0, maxval=1.0, dtype=jnp.float32)
    sn = jax.random.uniform(k2, (8,), minval=-1.0, maxval=1.0, dtype=jnp.float32)
    loss = circle_loss(sp, sn, m, gamma)
    jax.block_until_ready(loss)
    ref = _reference(sp, sn, m, gamma)
    assert jnp.allclose(loss, ref, rtol=1e-5, atol=1e-4), (loss, ref)

    # Case 2: bf16 inputs with unequal lengths (padding masks + in-kernel upcast).
    sp_b = jax.random.uniform(k3, (300,), minval=-1.0, maxval=1.0).astype(jnp.bfloat16)
    sn_b = jax.random.uniform(k4, (200,), minval=-1.0, maxval=1.0).astype(jnp.bfloat16)
    loss_b = circle_loss(sp_b, sn_b, m, gamma)
    jax.block_until_ready(loss_b)
    ref_b = _reference(sp_b, sn_b, m, gamma)
    assert jnp.allclose(loss_b, ref_b, rtol=1e-5, atol=1e-4), (loss_b, ref_b)

    # Case 3: exercise the streaming (multi-tile) path at small size by shrinking
    # the tile cap: partial last block, clamped index_map, fast + masked branches.
    sp_s = jax.random.uniform(k5, (2600,), minval=-1.0, maxval=1.0, dtype=jnp.float32)
    sn_s = jax.random.uniform(k6, (1000,), minval=-1.0, maxval=1.0, dtype=jnp.float32)
    loss_s = circle_loss(sp_s, sn_s, m, gamma, max_tile_rows=8)
    jax.block_until_ready(loss_s)
    ref_s = _reference(sp_s, sn_s, m, gamma)
    assert jnp.allclose(loss_s, ref_s, rtol=1e-5, atol=1e-4), (loss_s, ref_s)

    print("KERNEL_OK")
</pallas_src>

<mosaic_0001>
module attributes {stable_mosaic.version = 11 : i64} {
  func.func @_single_tile_kernel(%arg0: memref<1x128xf32, #tpu.memory_space<vmem>>, %arg1: memref<1x128xf32, #tpu.memory_space<vmem>>, %arg2: memref<1x1xf32, #tpu.memory_space<smem>>) attributes {dimension_semantics = [], scalar_prefetch = 0 : i64, scratch_operands = 0 : i64, tpu.core_type = #tpu.core_type<tc>} {
    %c0 = arith.constant 0 : index
    %c0_0 = arith.constant 0 : index
    %0 = vector.load %arg0[%c0, %c0_0] : memref<1x128xf32, #tpu.memory_space<vmem>>, vector<1x128xf32>
    %cst = arith.constant 0.000000e+00 : f32
    %1 = vector.broadcast %cst : f32 to vector<1x128xf32>
    %2 = arith.subf %1, %0 : vector<1x128xf32>
    %cst_1 = arith.constant 1.250000e+00 : f32
    %3 = vector.broadcast %cst_1 : f32 to vector<1x128xf32>
    %4 = arith.addf %2, %3 : vector<1x128xf32>
    %cst_2 = arith.constant 0.000000e+00 : f32
    %5 = vector.broadcast %cst_2 : f32 to vector<1x128xf32>
    %6 = arith.maximumf %4, %5 : vector<1x128xf32>
    %cst_3 = arith.constant 0.000000e+00 : f32
    %7 = vector.broadcast %cst_3 : f32 to vector<1x128xf32>
    %8 = arith.subf %7, %6 : vector<1x128xf32>
    %cst_4 = arith.constant 7.500000e-01 : f32
    %9 = vector.broadcast %cst_4 : f32 to vector<1x128xf32>
    %10 = arith.subf %0, %9 : vector<1x128xf32>
    %11 = arith.mulf %8, %10 : vector<1x128xf32>
    %cst_5 = arith.constant 6.400000e+01 : f32
    %12 = vector.broadcast %cst_5 : f32 to vector<1x128xf32>
    %13 = arith.mulf %11, %12 : vector<1x128xf32>
    %14 = tpu.iota {dimensions = array<i32: 0>} : vector<1x128xi32>
    %15 = tpu.iota {dimensions = array<i32: 1>} : vector<1x128xi32>
    %c128_i32 = arith.constant 128 : i32
    %16 = vector.broadcast %c128_i32 : i32 to vector<1x128xi32>
    %17 = arith.muli %14, %16 : vector<1x128xi32>
    %18 = arith.addi %17, %15 : vector<1x128xi32>
    %c8_i32 = arith.constant 8 : i32
    %19 = vector.broadcast %c8_i32 : i32 to vector<1x128xi32>
    %20 = arith.cmpi slt, %18, %19 : vector<1x128xi32>
    %cst_6 = arith.constant -1.000000e+30 : f32
    %21 = vector.broadcast %cst_6 : f32 to vector<1x128xf32>
    %22 = arith.select %20, %13, %21 : vector<1x128xi1>, vector<1x128xf32>
    %23 = vector.shape_cast %22 : vector<1x128xf32> to vector<1x1x128xf32>
    %cst_7 = arith.constant dense<0xFF800000> : vector<1xf32>
    %24 = vector.multi_reduction <maximumf>, %23, %cst_7 [1, 2] : vector<1x1x128xf32> to vector<1xf32>
    %25 = vector.shape_cast %24 : vector<1xf32> to vector<1x1x1xf32>
    %26 = vector.extract %25[0, 0, 0] : f32 from vector<1x1x1xf32>
    %27 = vector.broadcast %26 : f32 to vector<1x128xf32>
    %28 = arith.subf %22, %27 : vector<1x128xf32>
    %29 = math.exp %28 : vector<1x128xf32>
    %30 = vector.shape_cast %29 : vector<1x128xf32> to vector<1x1x128xf32>
    %cst_8 = arith.constant dense<0.000000e+00> : vector<1xf32>
    %31 = vector.multi_reduction <add>, %30, %cst_8 [1, 2] : vector<1x1x128xf32> to vector<1xf32>
    %32 = vector.shape_cast %31 : vector<1xf32> to vector<1x1x1xf32>
    %33 = vector.extract %32[0, 0, 0] : f32 from vector<1x1x1xf32>
    %34 = math.log %33 : f32
    %35 = arith.addf %26, %34 : f32
    %c0_9 = arith.constant 0 : index
    %c0_10 = arith.constant 0 : index
    %36 = vector.load %arg1[%c0_9, %c0_10] : memref<1x128xf32, #tpu.memory_space<vmem>>, vector<1x128xf32>
    %cst_11 = arith.constant 2.500000e-01 : f32
    %37 = vector.broadcast %cst_11 : f32 to vector<1x128xf32>
    %38 = arith.addf %36, %37 : vector<1x128xf32>
    %cst_12 = arith.constant 0.000000e+00 : f32
    %39 = vector.broadcast %cst_12 : f32 to vector<1x128xf32>
    %40 = arith.maximumf %38, %39 : vector<1x128xf32>
    %cst_13 = arith.constant 2.500000e-01 : f32
    %41 = vector.broadcast %cst_13 : f32 to vector<1x128xf32>
    %42 = arith.subf %36, %41 : vector<1x128xf32>
    %43 = arith.mulf %40, %42 : vector<1x128xf32>
    %cst_14 = arith.constant 6.400000e+01 : f32
    %44 = vector.broadcast %cst_14 : f32 to vector<1x128xf32>
    %45 = arith.mulf %43, %44 : vector<1x128xf32>
    %46 = tpu.iota {dimensions = array<i32: 0>} : vector<1x128xi32>
    %47 = tpu.iota {dimensions = array<i32: 1>} : vector<1x128xi32>
    %c128_i32_15 = arith.constant 128 : i32
    %48 = vector.broadcast %c128_i32_15 : i32 to vector<1x128xi32>
    %49 = arith.muli %46, %48 : vector<1x128xi32>
    %50 = arith.addi %49, %47 : vector<1x128xi32>
    %c8_i32_16 = arith.constant 8 : i32
    %51 = vector.broadcast %c8_i32_16 : i32 to vector<1x128xi32>
    %52 = arith.cmpi slt, %50, %51 : vector<1x128xi32>
    %cst_17 = arith.constant -1.000000e+30 : f32
    %53 = vector.broadcast %cst_17 : f32 to vector<1x128xf32>
    %54 = arith.select %52, %45, %53 : vector<1x128xi1>, vector<1x128xf32>
    %55 = vector.shape_cast %54 : vector<1x128xf32> to vector<1x1x128xf32>
    %cst_18 = arith.constant dense<0xFF800000> : vector<1xf32>
    %56 = vector.multi_reduction <maximumf>, %55, %cst_18 [1, 2] : vector<1x1x128xf32> to vector<1xf32>
    %57 = vector.shape_cast %56 : vector<1xf32> to vector<1x1x1xf32>
    %58 = vector.extract %57[0, 0, 0] : f32 from vector<1x1x1xf32>
    %59 = vector.broadcast %58 : f32 to vector<1x128xf32>
    %60 = arith.subf %54, %59 : vector<1x128xf32>
    %61 = math.exp %60 : vector<1x128xf32>
    %62 = vector.shape_cast %61 : vector<1x128xf32> to vector<1x1x128xf32>
    %cst_19 = arith.constant dense<0.000000e+00> : vector<1xf32>
    %63 = vector.multi_reduction <add>, %62, %cst_19 [1, 2] : vector<1x1x128xf32> to vector<1xf32>
    %64 = vector.shape_cast %63 : vector<1xf32> to vector<1x1x1xf32>
    %65 = vector.extract %64[0, 0, 0] : f32 from vector<1x1x1xf32>
    %66 = math.log %65 : f32
    %67 = arith.addf %58, %66 : f32
    %68 = arith.addf %35, %67 : f32
    %cst_20 = arith.constant 0.000000e+00 : f32
    %69 = arith.maximumf %68, %cst_20 : f32
    %70 = math.absf %68 : f32
    %cst_21 = arith.constant 0.000000e+00 : f32
    %71 = arith.subf %cst_21, %70 : f32
    %72 = math.exp %71 : f32
    %73 = math.log1p %72 : f32
    %74 = arith.addf %69, %73 : f32
    %c0_22 = arith.constant 0 : index
    %c0_23 = arith.constant 0 : index
    %75 = memref.load %arg2[%c0_22, %c0_23] : memref<1x1xf32, #tpu.memory_space<smem>>
    memref.store %74, %arg2[%c0_22, %c0_23] : memref<1x1xf32, #tpu.memory_space<smem>>
    return
  }
}

</mosaic_0001>

<bundles_post_ra>
// kernel: tpu_custom_call.1
= control target key start
LH: loop header
LB: loop body
LE: loop exit
PB: predicated region body
PF: predicated region fallthrough
CT: control target
= control target key end

     0   :  { %7 = vsyncpa [#allocation3], 0  ;;  %s264_s0 = inlined_call_operand.hbm [shape: f32[1,128], index: 0, kind: input, shape index: {}]   ;;  %s265_s1 = inlined_call_operand.vmem [shape: f32[1,128], index: 1, kind: input, shape index: {}]   ;;  %s266_s2 = inlined_call_operand.hbm [shape: f32[1,1], index: 2, kind: output, shape index: {}]  }
   0x1   :  { %8 = vsyncpa [#allocation4], 0  ;;  %s211_s9 = smov [#allocation2]   ;;  %s175_s13 = scalar_lea.hbm %s264_s0, 16 }
   0x2   :  { %s15_s10 = sshll.u32 %s211_s9, 4  ;;  %p176_p0 = scmp.ne.s32.totalorder %s264_s0, %s175_s13  ;;  %s16_s10 = int_to_ptr.vmem [resolvable:$true] %s15_s10 }
   0x3   :  { %p179_p1 = scmp.lt.u32.totalorder %s175_s13, %s264_s0 }
   0x5   :  { %p181_p2 = pnand %p179_p1, %p176_p0 }
   0x7   :  { %184 = shalt.err (!%p181_p2)
}
   0x8   :  { %s185_s18 = scalar_lea.vmem %s16_s10, 16  ;;  %s189_s19 = scalar_lea.vmem %s16_s10, 32 }
   0x9   :  { %p186_p3 = scmp.ne.s32.totalorder %s16_s10, %s185_s18  ;;  %p190_p4 = scmp.lt.s32.totalorder %s16_s10, %s16_s10 }
   0xa   :  { %p191_p5 = scmp.lt.s32.totalorder %s189_s19, %s185_s18 }
   0xc   :  { %p192_p6 = por %p191_p5, %p190_p4 }
   0xe   :  { %p193_p7 = pnand %p192_p6, %p186_p3 }
  0x10   :  { %196 = shalt.err (!%p193_p7)
}
  0x11   :  { %18 = dma.hbm_to_vmem [thread:$0]  %s264_s0, 16, %s16_s10, [#allocation3]  }
  0x12   :  { %207 = dma.done.wait [#allocation3], 16  }
  0x13   :  { %208 = vsyncadd [#allocation3], 4294967280  ;;  %v32_v0 = vlaneseq  ;;  %v24_v2 = vld [vmem:[#allocation2] sm:$0x1]  ;;  %vm40_vm1 = vcmask 1040384   ;;  %s212_s6 = smov 0.0  }
  0x14   :  { %v25_v3 = vsub.f32 0.0, %v24_v2  ;;  %v142_v8 = vadd.f32 -0.75, %v24_v2  ;;  %v70_v15 = vld [vmem:[%s265_s1] sm:$0x1]  ;;  %s197_s12 = scalar_lea.hbm %s266_s2, 16 }
  0x15   :  { %v33_v1 = vshrl.u32 %v32_v0, 7  ;;  %v35_v4 = vand.u32 127, %v32_v0  ;;  %v71_v16 = vadd.f32 0.25, %v70_v15  ;;  %v143_v17 = vadd.f32 -0.25, %v70_v15  ;;  %p198_p8 = scmp.ne.s32.totalorder %s266_s2, %s197_s12  ;;  %p201_p9 = scmp.lt.u32.totalorder %s197_s12, %s266_s2 }
  0x16   :  { %v26_v6 = vadd.f32 1.25, %v25_v3 }
  0x17   :  { %v36_v5 = vmul.u32 128, %v33_v1  ;;  %v72_v18 = vmax.f32 %v71_v16, 0.0  ;;  %p203_p10 = pnand %p201_p9, %p198_p8 }
  0x18   :  { %v27_v7 = vmax.f32 %v26_v6, 0.0 }
  0x19   :  { %v37_v9 = vadd.s32 %v36_v5, %v35_v4  ;;  %v74_v19 = vmul.f32 %v143_v17, %v72_v18 }
  0x1a   :  { %v28_v10 = vsub.f32 0.0, %v27_v7 }
  0x1b   :  { %vm38_vm0 = vcmp.lt.s32.totalorder %v37_v9, 8  ;;  %v75_v20 = vmul.f32 64.0, %v74_v19 }
  0x1c   :  { %v30_v11 = vmul.f32 %v142_v8, %v28_v10 }
  0x1d   :  { %v76_v21 = vsel %vm38_vm0, %v75_v20, -1e+30 }
  0x1e   :  { %v31_v12 = vmul.f32 64.0, %v30_v11  ;;  %v77_v22 = vsel %vm40_vm1, %v76_v21, -inf }
  0x1f   :  { %78 = vmax.xlane.f32.xlu1 %v77_v22 }
  0x20   :  { %v39_v13 = vsel %vm38_vm0, %v31_v12, -1e+30 }
  0x21   :  { %v41_v14 = vsel %vm40_vm1, %v39_v13, -inf }
  0x22   :  { %42 = vmax.xlane.f32.xlu0 %v41_v14 }
  0xac   :  { %v79_v42 = vpop.xlane.xlu1 %78 }
  0xad   :  { %v80_v43 = vrot.slane %v79_v42, 4 }
  0xaf   :  { %v43_v23 = vpop.xlane.xlu0 %42  ;;  %v81_v44 = vmax.f32 %v79_v42, %v80_v43 }
  0xb0   :  { %v44_v24 = vrot.slane %v43_v23, 4 }
  0xb1   :  { %v82_v46 = vrot.slane %v81_v44, 2 }
  0xb2   :  { %v45_v25 = vmax.f32 %v43_v23, %v44_v24 }
  0xb3   :  { %v83_v47 = vmax.f32 %v81_v44, %v82_v46 }
  0xb4   :  { %v46_v26 = vrot.slane %v45_v25, 2 }
  0xb5   :  { %v84_v48 = vrot.slane %v83_v47, 1 }
  0xb6   :  { %v47_v27 = vmax.f32 %v45_v25, %v46_v26 }
  0xb7   :  { %v85_v51 = vmax.f32 %v83_v47, %v84_v48 }
  0xb8   :  { %v48_v28 = vrot.slane %v47_v27, 1 }
  0xba   :  { %v49_v29 = vmax.f32 %v47_v27, %v48_v28 }
  0xbc   :  { %144 = vpush %v49_v29 }
  0xed   :  { %s246_s23 = spop %144 }
  0xee   :  { %v51_v30 = vstv %s246_s23 }
  0xef   :  { %v52_v31 = vsub.f32 %v39_v13, %v51_v30 }
  0xf1   :  { %v53_v32 = vmul.f32 1.442695, %v52_v31 }
  0xf3   :  { %163 = vpow2.f32 %v53_v32 }
  0xfd   :  { %v164_v33 = vpop.eup %163 }
  0xfe   :  { %v55_v34 = vsel %vm40_vm1, %v164_v33, 0.0 }
  0xff   :  { %56 = vadd.xlane.f32.xlu0 %v55_v34 }
 0x18c   :  { %v57_v35 = vpop.xlane.xlu0 %56 }
 0x18d   :  { %v58_v36 = vrot.slane %v57_v35, 4 }
 0x18f   :  { %v59_v37 = vadd.f32 %v58_v36, %v57_v35 }
 0x191   :  { %v60_v38 = vrot.slane %v59_v37, 2 }
 0x193   :  { %v61_v39 = vadd.f32 %v60_v38, %v59_v37 }
 0x195   :  { %v62_v40 = vrot.slane %v61_v39, 1 }
 0x197   :  { %v63_v41 = vadd.f32 %v62_v40, %v61_v39 }
 0x199   :  { %146 = vpush %v63_v41 }
 0x1ca   :  { %s147_s1 = spop %146 }
 0x1cb   :  { %v65_v45 = vstv %s147_s1 }
 0x1cc   :  { %165 = vlog2.f32 %v65_v45 }
 0x1d6   :  { %v166_v49 = vpop.eup %165 }
 0x1d7   :  { %v67_v50 = vmul.f32 0.6931472, %v166_v49 }
 0x1d9   :  { %148 = vpush %v67_v50 }
 0x1da   :  { %150 = vpush %v85_v51 }
 0x20a   :  { %s149_s24 = spop %148 }
 0x20b   :  { %s151_s25 = spop %150  ;;  %s69_s27 = sadd.f32 %s149_s24, %s246_s23 }
 0x20c   :  { %v87_v52 = vstv %s151_s25 }
 0x20d   :  { %v88_v53 = vsub.f32 %v76_v21, %v87_v52 }
 0x20f   :  { %v89_v54 = vmul.f32 1.442695, %v88_v53 }
 0x211   :  { %167 = vpow2.f32 %v89_v54 }
 0x21b   :  { %v168_v55 = vpop.eup %167 }
 0x21c   :  { %v91_v56 = vsel %vm40_vm1, %v168_v55, 0.0 }
 0x21d   :  { %92 = vadd.xlane.f32.xlu1 %v91_v56 }
 0x2aa   :  { %v93_v57 = vpop.xlane.xlu1 %92 }
 0x2ab   :  { %v94_v58 = vrot.slane %v93_v57, 4 }
 0x2ad   :  { %v95_v59 = vadd.f32 %v94_v58, %v93_v57 }
 0x2af   :  { %v96_v60 = vrot.slane %v95_v59, 2 }
 0x2b1   :  { %v97_v61 = vadd.f32 %v96_v60, %v95_v59 }
 0x2b3   :  { %v98_v62 = vrot.slane %v97_v61, 1 }
 0x2b5   :  { %v99_v63 = vadd.f32 %v98_v62, %v97_v61 }
 0x2b7   :  { %152 = vpush %v99_v63 }
 0x2e8   :  { %s153_s26 = spop %152 }
 0x2e9   :  { %v101_v0 = vstv %s153_s26 }
 0x2ea   :  { %169 = vlog2.f32 %v101_v0 }
 0x2f4   :  { %v170_v1 = vpop.eup %169 }
 0x2f5   :  { %v103_v2 = vmul.f32 0.6931472, %v170_v1 }
 0x2f7   :  { %154 = vpush %v103_v2 }
 0x328   :  { %s155_s28 = spop %154 }
 0x329   :  { %s105_s29 = sadd.f32 %s155_s28, %s151_s25 }
 0x32b   :  { %s106_s30 = sadd.f32 %s105_s29, %s69_s27 }
 0x32d   :  { %s108_s3 = sand.u32 2147483647, %s106_s30  ;;  %s107_s7 = smax.f32 %s212_s6, %s106_s30 }
 0x32e   :  { %s109_s4 = ssub.f32 0.0, %s108_s3 }
 0x330   :  { %v110_v3 = vstv %s109_s4 }
 0x331   :  { %v111_v4 = vmul.f32 1.442695, %v110_v3 }
 0x333   :  { %171 = vpow2.f32 %v111_v4 }
 0x33d   :  { %v172_v5 = vpop.eup %171 }
 0x33e   :  { %156 = vpush %v172_v5 }
 0x36f   :  { %s157_s5 = spop %156 }
 0x370   :  { %v114_v6 = vstv %s157_s5 }
 0x371   :  { %v115_v7 = vadd.f32 1.0, %v114_v6  ;;  %v118_v8 = vmul.f32 -0.5, %v114_v6  ;;  %v121_v10 = vand.u32 2147483647, %v114_v6 }
 0x373   :  { %173 = vlog2.f32 %v115_v7  ;;  %v119_v9 = vadd.f32 1.0, %v118_v8  ;;  %vm122_vm2 = vcmp.lt.f32.partialorder %v121_v10, 0.0004427343 }
 0x375   :  { %v120_v12 = vmul.f32 %v119_v9, %v114_v6 }
 0x37d   :  { %v174_v11 = vpop.eup %173 }
 0x37e   :  { %v117_v13 = vmul.f32 0.6931472, %v174_v11 }
 0x380   :  { %v123_v14 = vsel %vm122_vm2, %v120_v12, %v117_v13 }
 0x381   :  { %158 = vpush %v123_v14 }
 0x3b2   :  { %s159_s8 = spop %158 }
 0x3b3   :  { %s125_s9 = sadd.f32 %s159_s8, %s107_s7 }
 0x3b5   :  { %127 = sst [smem:[#allocation5]] %s125_s9 }
 0x3b6   :  { %206 = shalt.err (!%p203_p10)
}
 0x3b7   :  { %s213_s17 = smov [#allocation5]  }
 0x3b8   :  { %135 = dma.smem_to_hbm %s213_s17, 16, %s266_s2, [#allocation4]  }
 0x3b9   :  { %209 = dma.done.wait [#allocation4], 16  }
 0x3ba   :  { %210 = vsyncadd [#allocation4], 4294967280 }
 0x3bb   :  { %139 = sfence }
 0x3bc   :  { %140 = vsyncpa [#allocation3], 1 }
 0x3bd   :  { %141 = vsyncpa [#allocation4], 1 }

</bundles_post_ra>
